<compile_context>
chip_gen: v7x
topology: tpu7x:2x2x1
jax: 0.10.0
libtpu: 0.0.40
codegen_flags: <defaults>
</compile_context>

<pallas_src>
import jax
import jax.numpy as jnp
from jax.experimental import pallas as pl
from jax.experimental.pallas import tpu as pltpu


def _make_kernel(act_in_bf16):
    def kernel(x_ref, w1_ref, b1_ref, w2_ref, b2_ref, o_ref):
        # linear_1: bf16 x bf16 on the MXU, f32 accumulation.
        h = jnp.dot(x_ref[...], w1_ref[...], preferred_element_type=jnp.float32)
        h = h + b1_ref[...].astype(jnp.float32)
        if act_in_bf16:
            # v6e/v7x: bf16 VALU/EUP -> halves vreg traffic for the
            # [block_b, d_mid] activation and removes the separate f32->bf16
            # cast before the second matmul.
            hb = h.astype(jnp.bfloat16)
            act = hb * jax.nn.sigmoid(hb)
        else:
            # v5e: no bf16 VPU/EUP, keep SiLU in f32.
            act = h * jax.nn.sigmoid(h)
        # linear_2: activation in the weight dtype for a bf16 MXU pass.
        y = jnp.dot(act.astype(w2_ref.dtype), w2_ref[...],
                    preferred_element_type=jnp.float32)
        y = y + b2_ref[...].astype(jnp.float32)
        o_ref[...] = y.astype(o_ref.dtype)
    return kernel


def timestep_embedding(sample, w1, b1, w2, b2, *, block_b=None):
    """Fused linear_1 -> SiLU -> linear_2.

    sample: [B, in_channels]            (bf16 or f32)
    w1:     [in_channels, D]            (PyTorch weight transposed, bf16)
    b1:     [1, D]                      (f32)
    w2:     [D, D_out]                  (bf16)
    b2:     [1, D_out]                  (f32)

    block_b=None -> generation-aware path/tile selection; an explicit block_b
    forces the grid path whenever B > block_b.
    """
    B, c_in = sample.shape
    d_mid = w1.shape[1]
    d_out = w2.shape[1]

    kind = jax.devices()[0].device_kind.lower()
    is_v5 = "v5" in kind
    is_v7 = "v7" in kind
    n_cores = 2 if is_v7 else 1
    act_in_bf16 = not is_v5  # bf16 VPU/EUP exist on v6e/v7x

    # Per-core VMEM budget for this call (physical: 128 MiB v5e/v6e, 64 MiB/core
    # v7x). We always pass an explicit limit instead of relying on the
    # 16/32 MiB default scoped limit.
    vmem_budget = (40 if is_v7 else 96) << 20

    nbytes = lambda a: a.size * a.dtype.itemsize
    # Resident weights + biases. Counted twice: constant index maps mean the
    # blocks are DMA'd only once, but the pipeline still allocates them
    # double-buffered (pl.Buffered(1) would reclaim one copy if VMEM ever binds
    # at production sizes; not needed here).
    weight_bytes = 2 * (nbytes(w1) + nbytes(w2) + nbytes(b1) + nbytes(b2))
    # Per-row VMEM footprint: double-buffered x/out tiles + f32 intermediates.
    row_bytes = (2 * c_in * sample.dtype.itemsize
                 + 2 * d_out * sample.dtype.itemsize
                 + (d_mid + d_out) * 4)

    cost = pl.CostEstimate(
        flops=2 * B * (c_in * d_mid + d_mid * d_out),
        transcendentals=B * d_mid,  # sigmoid in SiLU
        bytes_accessed=(nbytes(sample) + nbytes(w1) + nbytes(b1) + nbytes(w2)
                        + nbytes(b2) + B * d_out * sample.dtype.itemsize),
    )

    kernel = _make_kernel(act_in_bf16)

    # NOTE: d_out is assumed to be a multiple of 128 (true for real diffusers
    # configs) so output stores stay lane-dense. c_in (e.g. 32) is left
    # unpadded: padding it to 128 would require padding `sample` too, which is
    # exactly the extra HBM traffic this version removes.

    # ---- path selection ---------------------------------------------------
    if block_b is None:
        fits_single = weight_bytes + B * row_bytes <= vmem_budget // 2
        # A grid is only worth it when the working set overflows VMEM, or on
        # v7x to split the batch across the two TensorCores; on 1-TC chips the
        # grid is a serial loop and only adds per-step overhead.
        use_grid = (not fits_single) or (n_cores > 1 and B > 256)
        if use_grid:
            block_b = 2048 if (not is_v5 and not is_v7) else 1024  # v6e / v5e,v7x
            if n_cores > 1:
                # Balance the two v7x cores: both get a full (real-data) block.
                per_core = -(-B // n_cores)
                block_b = min(block_b, ((per_core + 7) // 8) * 8)
            # Shrink if a single batch tile would blow the VMEM budget.
            while block_b > 8 and weight_bytes + block_b * row_bytes > vmem_budget // 2:
                block_b //= 2
    else:
        use_grid = B > block_b
    if use_grid and B <= block_b:
        use_grid = False

    if not use_grid:
        # Whole working set in VMEM: single block, no grid machinery.
        # TODO(synk): at diffusion-inference sizes (B<=8) this call is pure
        # weight-DMA latency; hiding it needs a cross-pallas_call W1/W2
        # prefetch (VMEM ref + DMA semaphore from a prior call) or fusion into
        # an adjacent kernel, which is not expressible in this standalone file.
        vmem_limit = int(min(vmem_budget,
                             max(32 << 20,
                                 weight_bytes + B * row_bytes + (4 << 20))))
        vmem = pl.BlockSpec(memory_space=pltpu.MemorySpace.VMEM)
        return pl.pallas_call(
            kernel,
            out_shape=jax.ShapeDtypeStruct((B, d_out), sample.dtype),
            in_specs=[vmem, vmem, vmem, vmem, vmem],
            out_specs=vmem,
            compiler_params=pltpu.CompilerParams(vmem_limit_bytes=vmem_limit),
            cost_estimate=cost,
        )(sample, w1, b1, w2, b2)

    # Grid over B only; ragged tail handled by Pallas (no pad/slice HBM
    # round-trip). Weights/biases use constant index maps so they are DMA'd
    # once and stay VMEM-resident across batch tiles; the parallel axis feeds
    # both v7x TensorCores.
    return pl.pallas_call(
        kernel,
        out_shape=jax.ShapeDtypeStruct((B, d_out), sample.dtype),
        grid=(pl.cdiv(B, block_b),),
        in_specs=[
            pl.BlockSpec((block_b, c_in), lambda i: (i, 0)),
            pl.BlockSpec((c_in, d_mid), lambda i: (0, 0)),
            pl.BlockSpec((1, d_mid), lambda i: (0, 0)),
            pl.BlockSpec((d_mid, d_out), lambda i: (0, 0)),
            pl.BlockSpec((1, d_out), lambda i: (0, 0)),
        ],
        out_specs=pl.BlockSpec((block_b, d_out), lambda i: (i, 0)),
        compiler_params=pltpu.CompilerParams(
            dimension_semantics=("parallel",),
            vmem_limit_bytes=int(vmem_budget)),
        cost_estimate=cost,
    )(sample, w1, b1, w2, b2)


def timestep_embedding_ref(sample, w1, b1, w2, b2):
    x = sample.astype(jnp.float32)
    h = x @ w1.astype(jnp.float32) + b1.astype(jnp.float32)
    h = h * jax.nn.sigmoid(h)
    y = (h.astype(w2.dtype).astype(jnp.float32) @ w2.astype(jnp.float32)
         + b2.astype(jnp.float32))
    return y.astype(sample.dtype)


if __name__ == "__main__":
    # TimestepEmbedding(in_channels=32, time_embed_dim=128) with defaults:
    # act_fn='silu', out_dim=None, post_act_fn=None, cond_proj_dim=None.
    # TODO(synk): cond_proj / post_act branches are not exercised (module
    # defaults disable them); the cond add would fuse as one extra bf16 matmul.
    key = jax.random.PRNGKey(0)
    k_x, k_w1, k_b1, k_w2, k_b2, k_x2 = jax.random.split(key, 6)

    C_IN, D = 32, 128

    # Weights/activations in bf16 (native MXU dtype); biases kept f32.
    w1 = (jax.random.uniform(k_w1, (C_IN, D), jnp.float32, -1.0, 1.0)
          / jnp.sqrt(C_IN)).astype(jnp.bfloat16)
    b1 = jax.random.uniform(k_b1, (1, D), jnp.float32, -1.0, 1.0) / jnp.sqrt(C_IN)
    w2 = (jax.random.uniform(k_w2, (D, D), jnp.float32, -1.0, 1.0)
          / jnp.sqrt(D)).astype(jnp.bfloat16)
    b2 = jax.random.uniform(k_b2, (1, D), jnp.float32, -1.0, 1.0) / jnp.sqrt(D)

    def check(sample, block_b):
        out = timestep_embedding(sample, w1, b1, w2, b2, block_b=block_b)
        out = jax.block_until_ready(out)
        ref = timestep_embedding_ref(sample, w1, b1, w2, b2)
        assert out.shape == ref.shape, (out.shape, ref.shape)
        assert jnp.allclose(out.astype(jnp.float32), ref.astype(jnp.float32),
                            atol=2e-2, rtol=2e-2), "mismatch vs reference"

    # Small-batch inference path (typical diffusion use): single block,
    # weights + sample fully VMEM-resident, no grid.
    sample_small = jax.random.normal(k_x, (8, C_IN), jnp.float32).astype(jnp.bfloat16)
    check(sample_small, block_b=None)

    # Grid path with a ragged tail (B not a multiple of block_b): exercises the
    # no-pad/no-slice batch tiling with VMEM-resident weights.
    sample_big = jax.random.normal(k_x2, (300, C_IN), jnp.float32).astype(jnp.bfloat16)
    check(sample_big, block_b=128)

    print("KERNEL_OK")
</pallas_src>

<mosaic_0001>
module attributes {stable_mosaic.version = 11 : i64} {
  func.func @kernel(%arg0: memref<8x32xbf16, #tpu.memory_space<vmem>>, %arg1: memref<32x128xbf16, #tpu.memory_space<vmem>>, %arg2: memref<1x128xf32, #tpu.memory_space<vmem>>, %arg3: memref<128x128xbf16, #tpu.memory_space<vmem>>, %arg4: memref<1x128xf32, #tpu.memory_space<vmem>>, %arg5: memref<8x128xbf16, #tpu.memory_space<vmem>>) attributes {dimension_semantics = [], scalar_prefetch = 0 : i64, scratch_operands = 0 : i64, tpu.core_type = #tpu.core_type<tc>} {
    %c0 = arith.constant 0 : index
    %c0_0 = arith.constant 0 : index
    %0 = vector.load %arg0[%c0, %c0_0] : memref<8x32xbf16, #tpu.memory_space<vmem>>, vector<8x32xbf16>
    %c0_1 = arith.constant 0 : index
    %c0_2 = arith.constant 0 : index
    %1 = vector.load %arg1[%c0_1, %c0_2] : memref<32x128xbf16, #tpu.memory_space<vmem>>, vector<32x128xbf16>
    %cst = arith.constant dense<0.000000e+00> : vector<8x128xf32>
    %2 = tpu.matmul %0, %1, %cst {dimension_numbers = #tpu.dot_dimension_numbers<[1], [0], [0], [1], [0, 0, 1, 1], [], []>} : vector<8x32xbf16>, vector<32x128xbf16>, vector<8x128xf32> -> vector<8x128xf32>
    %c0_3 = arith.constant 0 : index
    %c0_4 = arith.constant 0 : index
    %3 = vector.load %arg2[%c0_3, %c0_4] : memref<1x128xf32, #tpu.memory_space<vmem>>, vector<1x128xf32>
    %4 = vector.broadcast %3 : vector<1x128xf32> to vector<8x128xf32>
    %5 = arith.addf %2, %4 : vector<8x128xf32>
    %6 = arith.truncf %5 : vector<8x128xf32> to vector<8x128xbf16>
    %7 = arith.negf %6 : vector<8x128xbf16>
    %8 = math.exp %7 : vector<8x128xbf16>
    %cst_5 = arith.constant 1.000000e+00 : bf16
    %9 = vector.broadcast %cst_5 : bf16 to vector<8x128xbf16>
    %10 = arith.addf %9, %8 : vector<8x128xbf16>
    %11 = arith.divf %9, %10 : vector<8x128xbf16>
    %12 = arith.mulf %6, %11 : vector<8x128xbf16>
    %c0_6 = arith.constant 0 : index
    %c0_7 = arith.constant 0 : index
    %13 = vector.load %arg3[%c0_6, %c0_7] : memref<128x128xbf16, #tpu.memory_space<vmem>>, vector<128x128xbf16>
    %cst_8 = arith.constant dense<0.000000e+00> : vector<8x128xf32>
    %14 = tpu.matmul %12, %13, %cst_8 {dimension_numbers = #tpu.dot_dimension_numbers<[1], [0], [0], [1], [0, 0, 1, 1], [], []>} : vector<8x128xbf16>, vector<128x128xbf16>, vector<8x128xf32> -> vector<8x128xf32>
    %c0_9 = arith.constant 0 : index
    %c0_10 = arith.constant 0 : index
    %15 = vector.load %arg4[%c0_9, %c0_10] : memref<1x128xf32, #tpu.memory_space<vmem>>, vector<1x128xf32>
    %16 = vector.broadcast %15 : vector<1x128xf32> to vector<8x128xf32>
    %17 = arith.addf %14, %16 : vector<8x128xf32>
    %18 = arith.truncf %17 : vector<8x128xf32> to vector<8x128xbf16>
    %c0_11 = arith.constant 0 : index
    %c0_12 = arith.constant 0 : index
    %19 = vector.load %arg5[%c0_11, %c0_12] : memref<8x128xbf16, #tpu.memory_space<vmem>>, vector<8x128xbf16>
    tpu.vector_store %arg5[%c0_11, %c0_12], %18 {strides = array<i32>} : memref<8x128xbf16, #tpu.memory_space<vmem>>, vector<8x128xbf16>,
    return
  }
}

</mosaic_0001>

<bundles_post_ra>
// kernel: tpu_custom_call.1
= control target key start
LH: loop header
LB: loop body
LE: loop exit
PB: predicated region body
PF: predicated region fallthrough
CT: control target
= control target key end

     0   :  { %10 = vsyncpa [#allocation3], 0  ;;  %s536_s0 = inlined_call_operand.hbm [shape: bf16[8,32], index: 0, kind: input, shape index: {}]   ;;  %s537_s1 = inlined_call_operand.hbm [shape: bf16[32,128], index: 1, kind: input, shape index: {}]   ;;  %s538_s2 = inlined_call_operand.vmem [shape: f32[1,128], index: 2, kind: input, shape index: {}]   ;;  %s539_s3 = inlined_call_operand.hbm [shape: bf16[128,128], index: 3, kind: input, shape index: {}]   ;;  %s540_s4 = inlined_call_operand.vmem [shape: f32[1,128], index: 4, kind: input, shape index: {}]   ;;  %s541_s5 = inlined_call_operand.hbm [shape: bf16[8,128], index: 5, kind: output, shape index: {}]  }
   0x1   :  { %11 = vsyncpa [#allocation6], 0 }
   0x2   :  { %12 = vsyncpa [#allocation4], 0  ;;  %s438_s18 = smov [#allocation5]   ;;  %s344_s22 = scalar_lea.hbm %s537_s1, 256 }
   0x3   :  { %s28_s19 = sshll.u32 %s438_s18, 4  ;;  %p345_p0 = scmp.ne.s32.totalorder %s537_s1, %s344_s22  ;;  %s29_s19 = int_to_ptr.vmem [resolvable:$true] %s28_s19 }
   0x4   :  { %p348_p1 = scmp.lt.u32.totalorder %s344_s22, %s537_s1 }
   0x6   :  { %p350_p2 = pnand %p348_p1, %p345_p0 }
   0x8   :  { %353 = shalt.err (!%p350_p2)
}
   0x9   :  { %s354_s27 = scalar_lea.vmem %s29_s19, 256  ;;  %p359_p4 = scmp.lt.s32.totalorder %s29_s19, %s29_s19 }
   0xa   :  { %p355_p3 = scmp.ne.s32.totalorder %s29_s19, %s354_s27  ;;  %p360_p5 = scmp.lt.s32.totalorder %s354_s27, %s354_s27 }
   0xc   :  { %p361_p6 = por %p360_p5, %p359_p4 }
   0xe   :  { %p362_p7 = pnand %p361_p6, %p355_p3 }
  0x10   :  { %365 = shalt.err (!%p362_p7)
}
  0x11   :  { %s439_s28 = smov 64   ;;  %s440_s29 = smov 4  }
  0x12   :  { %34 = dma.hbm_to_vmem [thread:$0]  %s537_s1, 256, %s29_s19, [#allocation6], %s439_s28, %s439_s28, %s440_s29  }
  0x13   :  { %s441_s7 = smov [#allocation2]   ;;  %s442_s9 = smov [#allocation7]  }
  0x14   :  { %s19_s8 = sshll.u32 %s441_s7, 4  ;;  %s42_s10 = sshll.u32 %s442_s9, 4  ;;  %s20_s8 = int_to_ptr.vmem [resolvable:$true] %s19_s8  ;;  %s43_s10 = int_to_ptr.vmem [resolvable:$true] %s42_s10 }
  0x15   :  { %s366_s13 = scalar_lea.hbm %s536_s0, 64 }
  0x16   :  { %p367_p8 = scmp.ne.s32.totalorder %s536_s0, %s366_s13  ;;  %p370_p9 = scmp.lt.u32.totalorder %s366_s13, %s536_s0 }
  0x18   :  { %p372_p10 = pnand %p370_p9, %p367_p8 }
  0x1a   :  { %375 = shalt.err (!%p372_p10)
}
  0x1b   :  { %s376_s1 = scalar_lea.vmem %s20_s8, 64  ;;  %p381_p12 = scmp.lt.s32.totalorder %s20_s8, %s20_s8 }
  0x1c   :  { %p377_p11 = scmp.ne.s32.totalorder %s20_s8, %s376_s1  ;;  %p382_p13 = scmp.lt.s32.totalorder %s376_s1, %s376_s1 }
  0x1e   :  { %p383_p0 = por %p382_p13, %p381_p12 }
  0x20   :  { %p384_p1 = pnand %p383_p0, %p377_p11 }
  0x22   :  { %387 = shalt.err (!%p384_p1)
}
  0x23   :  { %22 = dma.hbm_to_vmem [thread:$0]  %s536_s0, 64, %s20_s8, [#allocation3]  }
  0x24   :  { %s388_s22 = scalar_lea.hbm %s539_s3, 1024 }
  0x25   :  { %p389_p2 = scmp.ne.s32.totalorder %s539_s3, %s388_s22  ;;  %p392_p3 = scmp.lt.u32.totalorder %s388_s22, %s539_s3 }
  0x27   :  { %p394_p4 = pnand %p392_p3, %p389_p2 }
  0x29   :  { %397 = shalt.err (!%p394_p4)
}
  0x2a   :  { %s398_s27 = scalar_lea.vmem %s43_s10, 1024  ;;  %p403_p6 = scmp.lt.s32.totalorder %s43_s10, %s43_s10 }
  0x2b   :  { %p399_p5 = scmp.ne.s32.totalorder %s43_s10, %s398_s27  ;;  %p404_p7 = scmp.lt.s32.totalorder %s398_s27, %s398_s27 }
  0x2d   :  { %p405_p8 = por %p404_p7, %p403_p6 }
  0x2f   :  { %p406_p9 = pnand %p405_p8, %p399_p5 }
  0x31   :  { %409 = shalt.err (!%p406_p9)
}
  0x32   :  { %48 = dma.hbm_to_vmem [thread:$0]  %s539_s3, 1024, %s43_s10, [#allocation6], %s439_s28, %s439_s28, %s440_s29  }
  0x33   :  { %432 = dma.done.wait [#allocation3], 64  }
  0x34   :  { %433 = vsyncadd [#allocation3], 4294967232 }
  0x35   :  { %434 = dma.done.wait [#allocation6], 1280  }
  0x36   :  { %435 = vsyncadd [#allocation6], 4294966016  ;;  %v443_v0 = vmov 0.0   ;;  %vm444_vm0 = vmmov 0   ;;  %v330_v1 = vld [vmem:[#allocation5] sm:$0xff]   ;;  %v331_v2 = vld [vmem:[#allocation5 + $0x8] sm:$0xff]  }
  0x37   :  { %294 = vmatprep.subr.bf16.mxu0 %v443_v0  ;;  %298 = vmatprep.mubr.msk.bf16.mxu0 %vm444_vm0, %v443_v0  ;;  %vm86_vm1 = vcmask 261120   ;;  %v62_v3 = vld [vmem:[#allocation2] sm:$0xf]  ;;  %v332_v4 = vld [vmem:[#allocation7] sm:$0xff]   ;;  %v334_v6 = vld [vmem:[#allocation7 + $0x10] sm:$0xff]  }
  0x38   :  { %302 = vmatprep.subr.bf16.mxu1 %v443_v0  ;;  %318 = vmatprep.mubr.msk.bf16.mxu1 %vm444_vm0, %v443_v0  ;;  %v333_v5 = vld [vmem:[#allocation7 + $0x8] sm:$0xff]   ;;  %v335_v7 = vld [vmem:[#allocation7 + $0x18] sm:$0xff]   ;;  %v336_v8 = vld [vmem:[#allocation7 + $0x20] sm:$0xff]  }
  0x39   :  { %295 = vmatpush3.bf16.msra.mxu0 %v330_v1  ;;  %303 = vmatpush3.bf16.msra.mxu1 %v332_v4  ;;  %v337_v9 = vld [vmem:[#allocation7 + $0x28] sm:$0xff]   ;;  %v338_v10 = vld [vmem:[#allocation7 + $0x30] sm:$0xff]   ;;  %v339_v11 = vld [vmem:[#allocation7 + $0x38] sm:$0xff]  }
  0x3a   :  { %296 = vmatprep.subr.bf16.mxu0 %v443_v0  ;;  %304 = vmatprep.subr.bf16.mxu1 %v443_v0  ;;  %v268_v12 = vld [vmem:[%s538_s2] ss:$0 sm:$0xff]  ;;  %s445_s2 = smov [#allocation8]  }
  0x3b   :  { %v273_v25 = vld [vmem:[%s540_s4] ss:$0 sm:$0xff]  ;;  %s258_s7 = sshll.u32 %s445_s2, 4  ;;  %s259_s7 = int_to_ptr.vmem [resolvable:$true] %s258_s7 }
  0x3c   :  { %s410_s8 = scalar_lea.vmem %s259_s7, 64  ;;  %p415_p11 = scmp.lt.s32.totalorder %s259_s7, %s259_s7 }
  0x3d   :  { %297 = vmatpush3.bf16.msra.mxu0 %v331_v2  ;;  %305 = vmatpush3.bf16.msra.mxu1 %v333_v5  ;;  %p411_p10 = scmp.ne.s32.totalorder %s259_s7, %s410_s8  ;;  %p416_p12 = scmp.lt.s32.totalorder %s410_s8, %s410_s8 }
  0x3e   :  { %306 = vmatprep.subr.bf16.mxu1 %v443_v0 }
  0x3f   :  { %p417_p13 = por %p416_p12, %p415_p11 }
  0x40   :  { %299 = vmatmul.mubr.msk.bf16.vlgmr.msra.gmra.mrb[0].mxu0 %vm86_vm1, %v62_v3 }
  0x41   :  { %307 = vmatpush3.bf16.msra.mxu1 %v334_v6  ;;  %p418_p0 = pnand %p417_p13, %p411_p10 }
  0x42   :  { %308 = vmatprep.subr.bf16.mxu1 %v443_v0 }
  0x45   :  { %309 = vmatpush3.bf16.msra.mxu1 %v335_v7 }
  0x46   :  { %310 = vmatprep.subr.bf16.mxu1 %v443_v0 }
  0x49   :  { %311 = vmatpush3.bf16.msra.mxu1 %v336_v8 }
  0x4a   :  { %312 = vmatprep.subr.bf16.mxu1 %v443_v0 }
  0x4d   :  { %313 = vmatpush3.bf16.msra.mxu1 %v337_v9 }
  0x4e   :  { %314 = vmatprep.subr.bf16.mxu1 %v443_v0 }
  0x51   :  { %315 = vmatpush3.bf16.msra.mxu1 %v338_v10 }
  0x52   :  { %316 = vmatprep.subr.bf16.mxu1 %v443_v0 }
  0x55   :  { %317 = vmatpush3.bf16.msra.mxu1 %v339_v11 }
 0x113   :  { %v124_v13 = vpop.f32.mrb[0].mxu0 }
 0x114   :  { %v125_v14 = vadd.f32 %v268_v12, %v124_v13  ;;  %v300_v15 = vpop.f32.mrb[1].mxu0 }
 0x115   :  { %v127_v16 = vpop.f32.mrb[2].mxu0 }
 0x116   :  { %v130_v17 = vpack.c.bf16 %v125_v14, %v125_v14  ;;  %v301_v18 = vpop.f32.mrb[3].mxu0 }
 0x118   :  { %v272_v19 = vmul.bf16 3216621497, %v130_v17 }
 0x11a   :  { %340 = vpow.bf16 %v272_v19 }
 0x125   :  { %v341_v20 = vpop.eup %340 }
 0x126   :  { %v135_v21 = vadd.bf16 1065369472, %v341_v20 }
 0x128   :  { %342 = vrcp.bf16 %v135_v21 }
 0x133   :  { %v343_v22 = vpop.eup %342 }
 0x134   :  { %v137_v23 = vmul.bf16 1065369472, %v343_v22 }
 0x136   :  { %v138_v24 = vmul.bf16 %v137_v23, %v130_v17 }
 0x138   :  { %319 = vmatmul.mubr.bf16.vlgmr.msra.gmra.mrb[0].mxu1 %v138_v24 }
 0x20b   :  { %v244_v26 = vpop.f32.mrb[0].mxu1 }
 0x20c   :  { %v245_v27 = vadd.f32 %v273_v25, %v244_v26  ;;  %v320_v28 = vpop.f32.mrb[1].mxu1 }
 0x20d   :  { %v247_v29 = vpop.f32.mrb[2].mxu1 }
 0x20e   :  { %v250_v30 = vpack.c.bf16 %v245_v27, %v245_v27  ;;  %v321_v31 = vpop.f32.mrb[3].mxu1 }
 0x210   :  { %251 = vst [vmem:[#allocation8] sm:$0xf] %v250_v30 }
 0x211   :  { %421 = shalt.err (!%p418_p0)
}
 0x212   :  { %s422_s4 = scalar_lea.hbm %s541_s5, 64 }
 0x213   :  { %p423_p1 = scmp.ne.s32.totalorder %s541_s5, %s422_s4  ;;  %p426_p2 = scmp.lt.u32.totalorder %s422_s4, %s541_s5 }
 0x215   :  { %p428_p3 = pnand %p426_p2, %p423_p1 }
 0x217   :  { %431 = shalt.err (!%p428_p3)
}
 0x218   :  { %261 = dma.vmem_to_hbm [thread:$0]  %s259_s7, 64, %s541_s5, [#allocation4]  }
 0x219   :  { %436 = dma.done.wait [#allocation4], 64  }
 0x21a   :  { %437 = vsyncadd [#allocation4], 4294967232 }
 0x21b   :  { %265 = vsyncpa [#allocation3], 1 }
 0x21c   :  { %266 = vsyncpa [#allocation6], 1 }
 0x21d   :  { %267 = vsyncpa [#allocation4], 1 }

</bundles_post_ra>
